<compile_context>
chip_gen: v6e
topology: v6e:2x2x1
jax: 0.10.0
libtpu: 0.0.40
codegen_flags: <defaults>
</compile_context>

<pallas_src>
import functools

import jax
import jax.numpy as jnp
from jax import lax
from jax.experimental import pallas as pl
from jax.experimental.pallas import tpu as pltpu


_Q_TILE = 512      # q rows per attention grid step
_KV_TILE = 256     # kv rows per attention grid step
_ROW_TILE = 1024   # rows per projection grid step (flattened B*L)


def _pick_tile(length, target):
    """Largest tile <= target that divides length; prefers 128-multiples.

    Never falls back to the full extent for long non-divisible lengths.
    """
    if length <= target:
        return length
    t = (target // 128) * 128
    while t >= 128:
        if length % t == 0:
            return t
        t -= 128
    for t in range(min(target, length), 0, -1):
        if length % t == 0:
            return t
    return length


# ---------------------------------------------------------------------------
# Fused K/V projection: one pallas_call, two outputs, bf16 results.
# ---------------------------------------------------------------------------
def _kv_proj_kernel(k_ref, v_ref, wk_ref, bk_ref, wv_ref, bv_ref,
                    ko_ref, vo_ref):
    xk = k_ref[...].astype(jnp.bfloat16)                       # (TL, D)
    xv = v_ref[...].astype(jnp.bfloat16)                       # (TL, D)
    kp = jnp.dot(xk, wk_ref[...], preferred_element_type=jnp.float32)
    vp = jnp.dot(xv, wv_ref[...], preferred_element_type=jnp.float32)
    ko_ref[...] = (kp + bk_ref[...]).astype(ko_ref.dtype)
    vo_ref[...] = (vp + bv_ref[...]).astype(vo_ref.dtype)


def _kv_project(k2d, v2d, wk, bk, wv, bv, *, row_tile=_ROW_TILE):
    """k2d, v2d: [N, D] (flattened B*Lk); weights bf16 [D, D]; biases [1, D]."""
    N, D = k2d.shape
    tl = _pick_tile(N, row_tile)
    const = pl.Buffered(1)   # weights/biases never change block
    return pl.pallas_call(
        _kv_proj_kernel,
        out_shape=(jax.ShapeDtypeStruct((N, D), jnp.bfloat16),
                   jax.ShapeDtypeStruct((N, D), jnp.bfloat16)),
        grid_spec=pltpu.PrefetchScalarGridSpec(
            num_scalar_prefetch=0,
            grid=(N // tl,),
            in_specs=[
                pl.BlockSpec((tl, D), lambda i: (i, 0)),
                pl.BlockSpec((tl, D), lambda i: (i, 0)),
                pl.BlockSpec((D, D), lambda i: (0, 0), pipeline_mode=const),
                pl.BlockSpec((1, D), lambda i: (0, 0), pipeline_mode=const),
                pl.BlockSpec((D, D), lambda i: (0, 0), pipeline_mode=const),
                pl.BlockSpec((1, D), lambda i: (0, 0), pipeline_mode=const),
            ],
            out_specs=[pl.BlockSpec((tl, D), lambda i: (i, 0)),
                       pl.BlockSpec((tl, D), lambda i: (i, 0))],
        ),
        compiler_params=pltpu.CompilerParams(
            dimension_semantics=("parallel",)),
    )(k2d, v2d, wk, bk, wv, bv)


# ---------------------------------------------------------------------------
# Flash attention with fused Q projection (scale pre-folded into wq/bq).
# ---------------------------------------------------------------------------
def _flash_kernel(q_ref, wq_ref, bq_ref, k_ref, v_ref, o_ref,
                  q_sc, m_sc, l_sc, acc_sc, *, num_sub, sub_tk):
    kv = pl.program_id(2)

    @pl.when(kv == 0)
    def _():
        # Project this q tile once (wq/bq are resident, scale already folded).
        x = q_ref[0].astype(jnp.bfloat16)                       # (TQ, D)
        qp = jnp.dot(x, wq_ref[...],
                     preferred_element_type=jnp.float32) + bq_ref[...]
        q_sc[...] = qp.astype(q_sc.dtype)                       # bf16
        m_sc[...] = jnp.full_like(m_sc, -jnp.inf)
        l_sc[...] = jnp.zeros_like(l_sc)
        acc_sc[...] = jnp.zeros_like(acc_sc)

    q_bf = q_sc[...]                                            # (TQ, D) bf16

    # Statically-unrolled kv sub-tiles: lets the scheduler overlap sub-tile
    # j+1's Q@K^T (MXU slot) with sub-tile j's exp (EUP slot).
    for j in range(num_sub):
        ks = k_ref[0, j * sub_tk:(j + 1) * sub_tk, :]           # (sub_tk, D)
        vs = v_ref[0, j * sub_tk:(j + 1) * sub_tk, :]           # (sub_tk, D)
        # Q @ K^T without materializing a transpose: contract the last dims.
        s = lax.dot_general(q_bf, ks,
                            dimension_numbers=(((1,), (1,)), ((), ())),
                            preferred_element_type=jnp.float32)  # (TQ, sub_tk)
        m_prev = m_sc[...]
        m_new = jnp.maximum(m_prev, jnp.max(s, axis=-1, keepdims=True))
        alpha = jnp.exp(m_prev - m_new)
        p = jnp.exp(s - m_new)
        l_sc[...] = alpha * l_sc[...] + jnp.sum(p, axis=-1, keepdims=True)
        acc_sc[...] = alpha * acc_sc[...] + jnp.dot(
            p.astype(jnp.bfloat16), vs, preferred_element_type=jnp.float32)
        m_sc[...] = m_new

    @pl.when(kv == pl.num_programs(2) - 1)
    def _():
        inv_l = pl.reciprocal(l_sc[...], approx=True)
        o_ref[0] = (acc_sc[...] * inv_l).astype(o_ref.dtype)


def softmax_cross_attention(q, k, v, wq, wk, wv, bq, bk, bv,
                            *, q_tile=_Q_TILE, kv_tile=_KV_TILE):
    """q: [B, Lq, D]; k, v: [B, Lk, D]; w*: [D, D] (in x out); b*: [1, D]."""
    B, Lq, D = q.shape
    _, Lk, _ = k.shape
    scale = float(D) ** -0.5

    # Pre-fold the softmax scale into the Q projection and pre-cast weights
    # to bf16 in the wrapper (halves weight DMA; no per-step cast/mul).
    wq_b = (wq * scale).astype(jnp.bfloat16)
    bq_f = (bq * scale).astype(jnp.float32)
    wk_b = wk.astype(jnp.bfloat16)
    wv_b = wv.astype(jnp.bfloat16)
    bk_f = bk.astype(jnp.float32)
    bv_f = bv.astype(jnp.float32)

    # K/V projected exactly once (single fused launch, bf16 outputs).
    Kp, Vp = _kv_project(k.reshape(B * Lk, D), v.reshape(B * Lk, D),
                         wk_b, bk_f, wv_b, bv_f)
    Kp = Kp.reshape(B, Lk, D)
    Vp = Vp.reshape(B, Lk, D)

    tq = _pick_tile(Lq, q_tile)
    tk = _pick_tile(Lk, kv_tile)
    num_sub = 2 if (tk % 256 == 0) else 1
    sub_tk = tk // num_sub

    kernel = functools.partial(_flash_kernel, num_sub=num_sub, sub_tk=sub_tk)
    const = pl.Buffered(1)

    return pl.pallas_call(
        kernel,
        out_shape=jax.ShapeDtypeStruct((B, Lq, D), q.dtype),
        grid_spec=pltpu.PrefetchScalarGridSpec(
            num_scalar_prefetch=0,
            grid=(B, Lq // tq, Lk // tk),
            in_specs=[
                pl.BlockSpec((1, tq, D), lambda b, qi, ki: (b, qi, 0)),
                pl.BlockSpec((D, D), lambda b, qi, ki: (0, 0),
                             pipeline_mode=const),
                pl.BlockSpec((1, D), lambda b, qi, ki: (0, 0),
                             pipeline_mode=const),
                pl.BlockSpec((1, tk, D), lambda b, qi, ki: (b, ki, 0)),
                pl.BlockSpec((1, tk, D), lambda b, qi, ki: (b, ki, 0)),
            ],
            out_specs=pl.BlockSpec((1, tq, D), lambda b, qi, ki: (b, qi, 0)),
            scratch_shapes=[
                pltpu.VMEM((tq, D), jnp.bfloat16),   # projected Q tile
                pltpu.VMEM((tq, 1), jnp.float32),    # running max
                pltpu.VMEM((tq, 1), jnp.float32),    # running sum
                pltpu.VMEM((tq, D), jnp.float32),    # f32 output accumulator
            ],
        ),
        compiler_params=pltpu.CompilerParams(
            dimension_semantics=("parallel", "parallel", "arbitrary")),
    )(q, wq_b, bq_f, Kp, Vp)


def _reference(q, k, v, wq, wk, wv, bq, bk, bv):
    D = q.shape[-1]
    scale = float(D) ** -0.5
    Q = q @ wq + bq
    K = k @ wk + bk
    V = v @ wv + bv
    scores = jnp.einsum("bqd,bkd->bqk", Q, K) * scale
    weights = jax.nn.softmax(scores, axis=-1)
    return jnp.einsum("bqk,bkd->bqd", weights, V)


if __name__ == "__main__":
    B, Lq, Lk, D = 2, 8, 8, 32
    key = jax.random.PRNGKey(0)
    kq, kk, kv, k1, k2, k3, k4, k5, k6 = jax.random.split(key, 9)

    q = jax.random.normal(kq, (B, Lq, D), dtype=jnp.float32)
    k = jax.random.normal(kk, (B, Lk, D), dtype=jnp.float32)
    v = jax.random.normal(kv, (B, Lk, D), dtype=jnp.float32)

    # Deterministic parameter init (PyTorch nn.Linear-style uniform bound),
    # stored pre-transposed as [in_dim, out_dim].
    bound = 1.0 / (D ** 0.5)
    wq = jax.random.uniform(k1, (D, D), jnp.float32, -bound, bound)
    wk = jax.random.uniform(k2, (D, D), jnp.float32, -bound, bound)
    wv = jax.random.uniform(k3, (D, D), jnp.float32, -bound, bound)
    bq = jax.random.uniform(k4, (1, D), jnp.float32, -bound, bound)
    bk = jax.random.uniform(k5, (1, D), jnp.float32, -bound, bound)
    bv = jax.random.uniform(k6, (1, D), jnp.float32, -bound, bound)

    out = softmax_cross_attention(q, k, v, wq, wk, wv, bq, bk, bv)
    out = jax.block_until_ready(out)

    ref = _reference(q, k, v, wq, wk, wv, bq, bk, bv)
    assert out.shape == (B, Lq, D)
    # bf16 MXU operands (f32 accumulation) => loosen tolerance vs all-f32 ref.
    assert jnp.allclose(out, ref, atol=2e-2, rtol=2e-2), "mismatch vs reference"
    print("KERNEL_OK")
</pallas_src>

<mosaic_0001>
module attributes {stable_mosaic.version = 11 : i64} {
  func.func @_kv_proj_kernel(%arg0: i32, %arg1: memref<16x32xf32, #tpu.memory_space<vmem>>, %arg2: memref<16x32xf32, #tpu.memory_space<vmem>>, %arg3: memref<32x32xbf16, #tpu.memory_space<vmem>>, %arg4: memref<1x32xf32, #tpu.memory_space<vmem>>, %arg5: memref<32x32xbf16, #tpu.memory_space<vmem>>, %arg6: memref<1x32xf32, #tpu.memory_space<vmem>>, %arg7: memref<16x32xbf16, #tpu.memory_space<vmem>>, %arg8: memref<16x32xbf16, #tpu.memory_space<vmem>>) attributes {dimension_semantics = [#tpu.dimension_semantics<parallel>], iteration_bounds = array<i64: 1>, scalar_prefetch = 0 : i64, scratch_operands = 0 : i64, tpu.core_type = #tpu.core_type<tc>, window_params = [{transform_indices = @transform_0, window_bounds = array<i64: 16, 32>}, {transform_indices = @transform_1, window_bounds = array<i64: 16, 32>}, {pipeline_mode = #tpu.pipeline_mode<synchronous>, transform_indices = @transform_2, window_bounds = array<i64: 32, 32>}, {pipeline_mode = #tpu.pipeline_mode<synchronous>, transform_indices = @transform_3, window_bounds = array<i64: 1, 32>}, {pipeline_mode = #tpu.pipeline_mode<synchronous>, transform_indices = @transform_4, window_bounds = array<i64: 32, 32>}, {pipeline_mode = #tpu.pipeline_mode<synchronous>, transform_indices = @transform_5, window_bounds = array<i64: 1, 32>}, {transform_indices = @transform_6, window_bounds = array<i64: 16, 32>}, {transform_indices = @transform_7, window_bounds = array<i64: 16, 32>}]} {
    %c0 = arith.constant 0 : index
    %c0_0 = arith.constant 0 : index
    %0 = vector.load %arg1[%c0, %c0_0] : memref<16x32xf32, #tpu.memory_space<vmem>>, vector<16x32xf32>
    %1 = arith.truncf %0 : vector<16x32xf32> to vector<16x32xbf16>
    %c0_1 = arith.constant 0 : index
    %c0_2 = arith.constant 0 : index
    %2 = vector.load %arg2[%c0_1, %c0_2] : memref<16x32xf32, #tpu.memory_space<vmem>>, vector<16x32xf32>
    %3 = arith.truncf %2 : vector<16x32xf32> to vector<16x32xbf16>
    %c0_3 = arith.constant 0 : index
    %c0_4 = arith.constant 0 : index
    %4 = vector.load %arg3[%c0_3, %c0_4] : memref<32x32xbf16, #tpu.memory_space<vmem>>, vector<32x32xbf16>
    %cst = arith.constant dense<0.000000e+00> : vector<16x32xf32>
    %5 = tpu.matmul %1, %4, %cst {dimension_numbers = #tpu.dot_dimension_numbers<[1], [0], [0], [1], [0, 0, 1, 1], [], []>} : vector<16x32xbf16>, vector<32x32xbf16>, vector<16x32xf32> -> vector<16x32xf32>
    %c0_5 = arith.constant 0 : index
    %c0_6 = arith.constant 0 : index
    %6 = vector.load %arg5[%c0_5, %c0_6] : memref<32x32xbf16, #tpu.memory_space<vmem>>, vector<32x32xbf16>
    %cst_7 = arith.constant dense<0.000000e+00> : vector<16x32xf32>
    %7 = tpu.matmul %3, %6, %cst_7 {dimension_numbers = #tpu.dot_dimension_numbers<[1], [0], [0], [1], [0, 0, 1, 1], [], []>} : vector<16x32xbf16>, vector<32x32xbf16>, vector<16x32xf32> -> vector<16x32xf32>
    %c0_8 = arith.constant 0 : index
    %c0_9 = arith.constant 0 : index
    %8 = vector.load %arg4[%c0_8, %c0_9] : memref<1x32xf32, #tpu.memory_space<vmem>>, vector<1x32xf32>
    %9 = vector.broadcast %8 : vector<1x32xf32> to vector<16x32xf32>
    %10 = arith.addf %5, %9 : vector<16x32xf32>
    %11 = arith.truncf %10 : vector<16x32xf32> to vector<16x32xbf16>
    %c0_10 = arith.constant 0 : index
    %c0_11 = arith.constant 0 : index
    %12 = vector.load %arg7[%c0_10, %c0_11] : memref<16x32xbf16, #tpu.memory_space<vmem>>, vector<16x32xbf16>
    tpu.vector_store %arg7[%c0_10, %c0_11], %11 {strides = array<i32>} : memref<16x32xbf16, #tpu.memory_space<vmem>>, vector<16x32xbf16>,
    %c0_12 = arith.constant 0 : index
    %c0_13 = arith.constant 0 : index
    %13 = vector.load %arg6[%c0_12, %c0_13] : memref<1x32xf32, #tpu.memory_space<vmem>>, vector<1x32xf32>
    %14 = vector.broadcast %13 : vector<1x32xf32> to vector<16x32xf32>
    %15 = arith.addf %7, %14 : vector<16x32xf32>
    %16 = arith.truncf %15 : vector<16x32xf32> to vector<16x32xbf16>
    %c0_14 = arith.constant 0 : index
    %c0_15 = arith.constant 0 : index
    %17 = vector.load %arg8[%c0_14, %c0_15] : memref<16x32xbf16, #tpu.memory_space<vmem>>, vector<16x32xbf16>
    tpu.vector_store %arg8[%c0_14, %c0_15], %16 {strides = array<i32>} : memref<16x32xbf16, #tpu.memory_space<vmem>>, vector<16x32xbf16>,
    return
  }
  func.func @transform_0(%arg0: i32) -> (i32, i32) {
    %c0_i32 = arith.constant 0 : i32
    %c0_i32_0 = arith.constant 0 : i32
    return %arg0, %c0_i32 : i32, i32
  }
  func.func @transform_1(%arg0: i32) -> (i32, i32) {
    %c0_i32 = arith.constant 0 : i32
    %c0_i32_0 = arith.constant 0 : i32
    return %arg0, %c0_i32 : i32, i32
  }
  func.func @transform_2(%arg0: i32) -> (i32, i32) {
    %c0_i32 = arith.constant 0 : i32
    %c0_i32_0 = arith.constant 0 : i32
    %c0_i32_1 = arith.constant 0 : i32
    return %c0_i32, %c0_i32_0 : i32, i32
  }
  func.func @transform_3(%arg0: i32) -> (i32, i32) {
    %c0_i32 = arith.constant 0 : i32
    %c0_i32_0 = arith.constant 0 : i32
    %c0_i32_1 = arith.constant 0 : i32
    return %c0_i32, %c0_i32_0 : i32, i32
  }
  func.func @transform_4(%arg0: i32) -> (i32, i32) {
    %c0_i32 = arith.constant 0 : i32
    %c0_i32_0 = arith.constant 0 : i32
    %c0_i32_1 = arith.constant 0 : i32
    return %c0_i32, %c0_i32_0 : i32, i32
  }
  func.func @transform_5(%arg0: i32) -> (i32, i32) {
    %c0_i32 = arith.constant 0 : i32
    %c0_i32_0 = arith.constant 0 : i32
    %c0_i32_1 = arith.constant 0 : i32
    return %c0_i32, %c0_i32_0 : i32, i32
  }
  func.func @transform_6(%arg0: i32) -> (i32, i32) {
    %c0_i32 = arith.constant 0 : i32
    %c0_i32_0 = arith.constant 0 : i32
    return %arg0, %c0_i32 : i32, i32
  }
  func.func @transform_7(%arg0: i32) -> (i32, i32) {
    %c0_i32 = arith.constant 0 : i32
    %c0_i32_0 = arith.constant 0 : i32
    return %arg0, %c0_i32 : i32, i32
  }
}

</mosaic_0001>

<bundles_post_ra>
// kernel: tpu_custom_call.1
= control target key start
LH: loop header
LB: loop body
LE: loop exit
PB: predicated region body
PF: predicated region fallthrough
CT: control target
= control target key end

     0   :  { %13 = vsyncpa [#allocation3], 0  ;;  %s556_s0 = inlined_call_operand.hbm [shape: f32[16,32], index: 0, kind: input, shape index: {}]   ;;  %s557_s1 = inlined_call_operand.hbm [shape: f32[16,32], index: 1, kind: input, shape index: {}]   ;;  %s558_s2 = inlined_call_operand.hbm [shape: bf16[32,32], index: 2, kind: input, shape index: {}]   ;;  %s559_s3 = inlined_call_operand.vmem [shape: f32[1,32], index: 3, kind: input, shape index: {}]   ;;  %s560_s4 = inlined_call_operand.hbm [shape: bf16[32,32], index: 4, kind: input, shape index: {}]   ;;  %s561_s5 = inlined_call_operand.vmem [shape: f32[1,32], index: 5, kind: input, shape index: {}]   ;;  %s562_s6 = inlined_call_operand.hbm [shape: bf16[16,32], index: 6, kind: output, shape index: {0}]   ;;  %s563_s7 = inlined_call_operand.hbm [shape: bf16[16,32], index: 7, kind: output, shape index: {1}]  }
   0x1   :  { %14 = vsyncpa [#allocation6], 0 }
   0x2   :  { %15 = vsyncpa [#allocation9], 0 }
   0x3   :  { %16 = vsyncpa [#allocation4], 0 }
   0x4   :  { %17 = vsyncpa [#allocation12], 0  ;;  %s464_s24 = smov [#allocation5]   ;;  %s465_s26 = smov [#allocation2]  }
   0x5   :  { %s35_s25 = sshll.u32 %s464_s24, 4  ;;  %s23_s27 = sshll.u32 %s465_s26, 4  ;;  %s36_s25 = int_to_ptr.vmem [resolvable:$true] %s35_s25  ;;  %s24_s27 = int_to_ptr.vmem [resolvable:$true] %s23_s27 }
   0x6   :  { %s342_s28 = scalar_lea.vmem %s36_s25, 256  ;;  %p347_p1 = scmp.lt.s32.totalorder %s36_s25, %s36_s25 }
   0x7   :  { %p343_p0 = scmp.ne.s32.totalorder %s36_s25, %s342_s28  ;;  %p348_p2 = scmp.lt.s32.totalorder %s342_s28, %s342_s28 }
   0x9   :  { %p349_p3 = por %p348_p2, %p347_p1 }
   0xb   :  { %p350_p4 = pnand %p349_p3, %p343_p0 }
   0xd   :  { %353 = shalt.err (!%p350_p4)
}
   0xe   :  { %s466_s29 = smov 128   ;;  %s467_s30 = smov 8  }
   0xf   :  { %41 = dma.hbm_to_vmem [thread:$0]  %s557_s1, 256, %s36_s25, [#allocation6], %s466_s29, %s466_s29, %s467_s30  }
  0x10   :  { %s362_s10 = scalar_lea.vmem %s24_s27, 256  ;;  %p367_p6 = scmp.lt.s32.totalorder %s24_s27, %s24_s27 }
  0x11   :  { %p363_p5 = scmp.ne.s32.totalorder %s24_s27, %s362_s10  ;;  %p368_p7 = scmp.lt.s32.totalorder %s362_s10, %s362_s10 }
  0x13   :  { %p369_p8 = por %p368_p7, %p367_p6 }
  0x15   :  { %p370_p9 = pnand %p369_p8, %p363_p5 }
  0x17   :  { %373 = shalt.err (!%p370_p9)
}
  0x18   :  { %29 = dma.hbm_to_vmem [thread:$0]  %s556_s0, 256, %s24_s27, [#allocation3], %s466_s29, %s466_s29, %s467_s30  }
  0x19   :  { %s468_s13 = smov [#allocation7]  }
  0x1a   :  { %s47_s14 = sshll.u32 %s468_s13, 4  ;;  %s48_s14 = int_to_ptr.vmem [resolvable:$true] %s47_s14 }
  0x1b   :  { %s382_s15 = scalar_lea.vmem %s48_s14, 256  ;;  %p387_p11 = scmp.lt.s32.totalorder %s48_s14, %s48_s14 }
  0x1c   :  { %p383_p10 = scmp.ne.s32.totalorder %s48_s14, %s382_s15  ;;  %p388_p12 = scmp.lt.s32.totalorder %s382_s15, %s382_s15 }
  0x1e   :  { %p389_p13 = por %p388_p12, %p387_p11 }
  0x20   :  { %p390_p0 = pnand %p389_p13, %p383_p10 }
  0x22   :  { %393 = shalt.err (!%p390_p0)
}
  0x23   :  { %s469_s1 = smov 64   ;;  %s470_s16 = smov 4  }
  0x24   :  { %53 = dma.hbm_to_vmem [thread:$0]  %s558_s2, 256, %s48_s14, [#allocation6], %s469_s1, %s469_s1, %s470_s16  }
  0x25   :  { %s471_s0 = smov [#allocation8]  }
  0x26   :  { %s61_s19 = sshll.u32 %s471_s0, 4  ;;  %s62_s19 = int_to_ptr.vmem [resolvable:$true] %s61_s19 }
  0x27   :  { %s402_s20 = scalar_lea.vmem %s62_s19, 256  ;;  %p407_p2 = scmp.lt.s32.totalorder %s62_s19, %s62_s19 }
  0x28   :  { %p403_p1 = scmp.ne.s32.totalorder %s62_s19, %s402_s20  ;;  %p408_p3 = scmp.lt.s32.totalorder %s402_s20, %s402_s20 }
  0x2a   :  { %p409_p4 = por %p408_p3, %p407_p2 }
  0x2c   :  { %p410_p5 = pnand %p409_p4, %p403_p1 }
  0x2e   :  { %413 = shalt.err (!%p410_p5)
}
  0x2f   :  { %67 = dma.hbm_to_vmem [thread:$0]  %s560_s4, 256, %s62_s19, [#allocation9], %s469_s1, %s469_s1, %s470_s16  }
  0x30   :  { %454 = dma.done.wait [#allocation3], 256  }
  0x31   :  { %455 = vsyncadd [#allocation3], 4294967040 }
  0x32   :  { %456 = dma.done.wait [#allocation6], 512  }
  0x33   :  { %457 = vsyncadd [#allocation6], 4294966784 }
  0x34   :  { %458 = dma.done.wait [#allocation9], 256  }
  0x35   :  { %459 = vsyncadd [#allocation9], 4294967040  ;;  %v472_v0 = vmov 0.0   ;;  %vm473_vm0 = vmmov 0   ;;  %v330_v1 = vld [vmem:[#allocation7 + $0x8] sm:$0xff]   ;;  %v331_v2 = vld [vmem:[#allocation8 + $0x8] sm:$0xff]  }
  0x36   :  { %302 = vmatprep.subr.bf16.mxu0 %v472_v0  ;;  %310 = vmatprep.subr.bf16.mxu1 %v472_v0  ;;  %v332_v3 = vld [vmem:[#allocation7] sm:$0xff]   ;;  %v333_v4 = vld [vmem:[#allocation8] sm:$0xff]   ;;  %v84_v6 = vld [vmem:[#allocation2 + $0x8] sm:$0xff]  ;;  %vm116_vm1 = vcmask 261120   ;;  %vm169_vm2 = vcmask 257024   ;;  %s474_s25 = smov [#allocation10]  }
  0x37   :  { %306 = vmatprep.mubr.msk.bf16.mxu0 %vm473_vm0, %v472_v0  ;;  %314 = vmatprep.mubr.msk.bf16.mxu1 %vm473_vm0, %v472_v0  ;;  %v83_v5 = vld [vmem:[#allocation2] sm:$0xff]  ;;  %v86_v7 = vld [vmem:[#allocation5] sm:$0xff]  ;;  %v87_v9 = vld [vmem:[#allocation5 + $0x8] sm:$0xff]  ;;  %s250_s26 = sshll.u32 %s474_s25, 4  ;;  %s251_s26 = int_to_ptr.vmem [resolvable:$true] %s250_s26 }
  0x38   :  { %303 = vmatpush3.bf16.msra.mxu0 %v330_v1  ;;  %311 = vmatpush3.bf16.msra.mxu1 %v331_v2  ;;  %v85_v8 = vpack.c.bf16 %v84_v6, %v83_v5  ;;  %v88_v10 = vpack.c.bf16 %v87_v9, %v86_v7  ;;  %v280_v11 = vld [vmem:[%s559_s3] ss:$0 sm:$0xff]  ;;  %s475_s3 = smov [#allocation11]   ;;  %p419_p7 = scmp.lt.s32.totalorder %s251_s26, %s251_s26 }
  0x39   :  { %304 = vmatprep.subr.bf16.mxu0 %v472_v0  ;;  %312 = vmatprep.subr.bf16.mxu1 %v472_v0  ;;  %v286_v12 = vld [vmem:[%s561_s5] ss:$0 sm:$0xff]  ;;  %s262_s27 = sshll.u32 %s475_s3, 4  ;;  %s414_s5 = scalar_lea.vmem %s251_s26, 128  ;;  %s263_s27 = int_to_ptr.vmem [resolvable:$true] %s262_s27 }
  0x3a   :  { %p415_p6 = scmp.ne.s32.totalorder %s251_s26, %s414_s5  ;;  %p420_p8 = scmp.lt.s32.totalorder %s414_s5, %s414_s5 }
  0x3c   :  { %305 = vmatpush3.bf16.msra.mxu0 %v332_v3  ;;  %313 = vmatpush3.bf16.msra.mxu1 %v333_v4  ;;  %p421_p9 = por %p420_p8, %p419_p7 }
  0x3e   :  { %p422_p10 = pnand %p421_p9, %p415_p6 }
  0x3f   :  { %307 = vmatmul.mubr.msk.bf16.vlgmr.msra.gmra.mxu0 %vm116_vm1, %v85_v8  ;;  %315 = vmatmul.mubr.msk.bf16.vlgmr.msra.gmra.mxu1 %vm116_vm1, %v88_v10 }
  0xff   :  { %v154_v13 = vpop.f32.mrf.mxu0  ;;  %v228_v15 = vpop.f32.mrf.mxu1 }
 0x100   :  { %v155_v14 = vadd.f32 %v280_v11, %v154_v13  ;;  %v229_v16 = vadd.f32 %v286_v12, %v228_v15 }
 0x101   :  { %v308_v17 = vpop.f32.mrf.mxu0  ;;  %v316_v19 = vpop.f32.mrf.mxu1 }
 0x102   :  { %v292_v18 = vpack.c.bf16 %v155_v14, %v155_v14  ;;  %v294_v20 = vpack.c.bf16 %v229_v16, %v229_v16 }
 0x103   :  { %v157_v21 = vpop.f32.mrf.mxu0  ;;  %v231_v23 = vpop.f32.mrf.mxu1 }
 0x104   :  { %v158_v22 = vadd.f32 %v280_v11, %v157_v21  ;;  %170 = vst.msk [vmem:[#allocation10] sm:$0xf] %vm169_vm2, %v292_v18  ;;  %v232_v24 = vadd.f32 %v286_v12, %v231_v23  ;;  %243 = vst.msk [vmem:[#allocation11] sm:$0xf] %vm169_vm2, %v294_v20 }
 0x105   :  { %v309_v25 = vpop.f32.mrf.mxu0  ;;  %v317_v27 = vpop.f32.mrf.mxu1 }
 0x106   :  { %v293_v26 = vpack.c.bf16 %v158_v22, %v158_v22  ;;  %v295_v28 = vpack.c.bf16 %v232_v24, %v232_v24 }
 0x108   :  { %171 = vst.msk [vmem:[#allocation10 + $0x4] sm:$0xf] %vm169_vm2, %v293_v26 }
 0x109   :  { %425 = shalt.err (!%p422_p10)
}
 0x10a   :  { %256 = dma.vmem_to_hbm [thread:$0]  %s251_s26, 128, %s562_s6, [#allocation4], %s469_s1, %s469_s1, %s470_s16   ;;  %244 = vst.msk [vmem:[#allocation11 + $0x4] sm:$0xf] %vm169_vm2, %v295_v28 }
 0x10b   :  { %s434_s30 = scalar_lea.vmem %s263_s27, 128  ;;  %p439_p12 = scmp.lt.s32.totalorder %s263_s27, %s263_s27 }
 0x10c   :  { %p435_p11 = scmp.ne.s32.totalorder %s263_s27, %s434_s30  ;;  %p440_p13 = scmp.lt.s32.totalorder %s434_s30, %s434_s30 }
 0x10e   :  { %p441_p0 = por %p440_p13, %p439_p12 }
 0x110   :  { %p442_p1 = pnand %p441_p0, %p435_p11 }
 0x112   :  { %445 = shalt.err (!%p442_p1)
}
 0x113   :  { %268 = dma.vmem_to_hbm [thread:$0]  %s263_s27, 128, %s563_s7, [#allocation12], %s469_s1, %s469_s1, %s470_s16  }
 0x114   :  { %460 = dma.done.wait [#allocation4], 128  }
 0x115   :  { %461 = vsyncadd [#allocation4], 4294967168 }
 0x116   :  { %462 = dma.done.wait [#allocation12], 128  }
 0x117   :  { %463 = vsyncadd [#allocation12], 4294967168 }
 0x118   :  { %275 = vsyncpa [#allocation3], 1 }
 0x119   :  { %276 = vsyncpa [#allocation6], 1 }
 0x11a   :  { %277 = vsyncpa [#allocation9], 1 }
 0x11b   :  { %278 = vsyncpa [#allocation4], 1 }
 0x11c   :  { %279 = vsyncpa [#allocation12], 1 }

</bundles_post_ra>
